<compile_context>
chip_gen: v7x
topology: tpu7x:2x2x1
jax: 0.10.0
libtpu: 0.0.40
codegen_flags: <defaults>
</compile_context>

<pallas_src>
import jax
import jax.numpy as jnp
from jax import lax
from jax.experimental import pallas as pl
from jax.experimental.pallas import tpu as pltpu

_LANE = 128
_MIB = 1024 * 1024

# Per-buffer x-tile byte budget.  ~4 MiB per buffer -> < ~10 MiB total
# double-buffered footprint: inside v5e's 16 MiB scoped default, v6e/v7x's
# 32 MiB, and leaves most of v7x's 64 MiB physical VMEM untouched, while big
# enough (multi-MiB tiles) to sit near the HBM roofline.
_X_TILE_BYTES = 4 * _MIB

# Below this resident-VMEM footprint we skip the grid entirely: per-step grid
# overhead (~0.35 us) dominates and there is nothing worth pipelining.
_SMALL_VMEM_BYTES = 2 * _MIB


def _round_up(x, m):
    return (x + m - 1) // m * m


def _pick_block_rows(batch, padded_row_bytes):
    """Rows per x tile.

    Fill the byte budget, cap so the 1-D grid always has >= 2 steps (lets
    dimension_semantics=("parallel",) shard row tiles across both v7x
    TensorCores), and keep a multiple of 128 so the lane-dense O==1 output
    block (1, block_rows) satisfies the (8, 128) block constraint.
    """
    budget_rows = max(_X_TILE_BYTES // padded_row_bytes, 1)
    two_step_cap = _round_up(pl.cdiv(batch, 2), _LANE)
    rows = min(budget_rows, two_step_cap)
    rows = max((rows // _LANE) * _LANE, _LANE)
    return rows


def _linear_o1_kernel(x_ref, w_ref, b_ref, o_ref):
    """n_outputs == 1 specialization with a lane-dense output row.

    result[0, m] = sum_k w[0, k] * x[m, k]  ==  (w @ x^T)[0, m]
    Contracting both operands on their last (lane) dim keeps the weight in
    its PyTorch layout and makes the output tile a dense 128-lane row
    (unmasked vst) instead of a (TM, 1) column of masked 4-byte stores —
    that column layout is the measured worst case, especially on v5e's
    single vector-store slot.  Accumulation is f32 on the MXU (the kernel is
    HBM-bound, so MXU under-utilisation at M=1 is irrelevant).
    The bias is a single f32 scalar read from SMEM (no VMEM DMA stream).
    """
    acc = lax.dot_general(
        w_ref[...], x_ref[...],
        dimension_numbers=(((1,), (1,)), ((), ())),
        preferred_element_type=jnp.float32,
    )                                                  # (1, TM) f32, lane-dense
    o_ref[...] = (acc + b_ref[0]).astype(o_ref.dtype)


def _linear_general_kernel(x_ref, w_ref, b_ref, o_ref):
    """General n_outputs: x (TM, F) . W (O, F) contracted on the feature dim.

    W stays in PyTorch (O, F) layout; contracting on the last dims avoids a
    host-side weight.T (which XLA may materialise as an extra HBM pass for
    wide layers).  W is grid-invariant and VMEM-resident, so any relayout the
    MXU needs happens on-chip and is hidden under the x-tile DMA.
    """
    acc = lax.dot_general(
        x_ref[...], w_ref[...],
        dimension_numbers=(((1,), (1,)), ((), ())),
        preferred_element_type=jnp.float32,
    )                                                  # (TM, O) f32
    o_ref[...] = (acc + b_ref[...]).astype(o_ref.dtype)


def linear_regression_forward(x, weight, bias):
    """y = x @ weight.T + bias, with weight in PyTorch nn.Linear (O, F) layout."""
    B, F = x.shape
    O, F2 = weight.shape
    assert F == F2, (F, F2)

    itemsize = jnp.dtype(x.dtype).itemsize
    # VMEM bytes per x row, accounting for lane padding: an F<128 row still
    # occupies a full 128-lane vreg row on chip.
    padded_row_bytes = _round_up(max(F, 1), _LANE) * itemsize
    x_vmem_bytes = _round_up(B, 8) * padded_row_bytes

    vmem = pltpu.MemorySpace.VMEM
    smem = pltpu.MemorySpace.SMEM

    if O == 1:
        kernel = _linear_o1_kernel
        w_arg = weight                                   # (1, F), no transpose anywhere
        b_arg = bias.astype(jnp.float32).reshape((1,))   # f32 scalar, lives in SMEM
    else:
        kernel = _linear_general_kernel
        w_arg = weight                                   # keep (O, F); contract in-kernel
        b_arg = bias.reshape((1, O))

    # ---- Tiny problem: one un-gridded tile, no pipelining scaffolding. ----
    if x_vmem_bytes <= _SMALL_VMEM_BYTES:
        if O == 1:
            out = pl.pallas_call(
                kernel,
                out_shape=jax.ShapeDtypeStruct((1, B), x.dtype),
                in_specs=[
                    pl.BlockSpec(memory_space=vmem),     # x
                    pl.BlockSpec(memory_space=vmem),     # weight
                    pl.BlockSpec(memory_space=smem),     # bias scalar
                ],
                out_specs=pl.BlockSpec(memory_space=vmem),
            )(x, w_arg, b_arg)
            return out.reshape(B, 1)
        return pl.pallas_call(
            kernel,
            out_shape=jax.ShapeDtypeStruct((B, O), x.dtype),
            in_specs=[
                pl.BlockSpec(memory_space=vmem),
                pl.BlockSpec(memory_space=vmem),
                pl.BlockSpec(memory_space=vmem),
            ],
            out_specs=pl.BlockSpec(memory_space=vmem),
        )(x, w_arg, b_arg)

    # ---- Row-tiled streaming path (ragged last block; no pad, no slice of x). ----
    block_rows = _pick_block_rows(B, padded_row_bytes)
    num_tiles = pl.cdiv(B, block_rows)

    compiler_params = pltpu.CompilerParams(
        # Only pays off on v7x's two TensorCores; harmless documentation on
        # single-TC v5e/v6e.
        dimension_semantics=("parallel",),
        # Explicit scoped-VMEM limit: >= all per-generation defaults, well
        # under v7x's 64 MiB physical; our double-buffered footprint is ~10 MiB.
        vmem_limit_bytes=32 * _MIB,
    )

    x_spec = pl.BlockSpec((block_rows, F), lambda i: (i, 0))     # ragged last block OK
    w_spec = pl.BlockSpec(w_arg.shape, lambda i: (0, 0))         # grid-invariant weight

    if O == 1:
        # Lane-dense output: (1, B) written in (1, block_rows) row tiles.
        out = pl.pallas_call(
            kernel,
            out_shape=jax.ShapeDtypeStruct((1, B), x.dtype),
            grid=(num_tiles,),
            in_specs=[x_spec, w_spec, pl.BlockSpec(memory_space=smem)],
            out_specs=pl.BlockSpec((1, block_rows), lambda i: (0, i)),
            compiler_params=compiler_params,
        )(x, w_arg, b_arg)
        return out.reshape(B, 1)        # trivial: B*4 bytes, layout-only reshape

    out = pl.pallas_call(
        kernel,
        out_shape=jax.ShapeDtypeStruct((B, O), x.dtype),
        grid=(num_tiles,),
        in_specs=[x_spec, w_spec, pl.BlockSpec((1, O), lambda i: (0, 0))],
        out_specs=pl.BlockSpec((block_rows, O), lambda i: (i, 0)),
        compiler_params=compiler_params,
    )(x, w_arg, b_arg)
    return out


if __name__ == "__main__":
    # Shapes consistent with the module: batch=8, n_features=32, n_outputs=1.
    batch, n_features, n_outputs = 8, 32, 1

    key = jax.random.PRNGKey(0)
    kx, kw, kb = jax.random.split(key, 3)

    x = jax.random.normal(kx, (batch, n_features), dtype=jnp.float32)
    bound = 1.0 / (n_features ** 0.5)            # nn.Linear default init range
    weight = jax.random.uniform(
        kw, (n_outputs, n_features), minval=-bound, maxval=bound, dtype=jnp.float32
    )
    bias = jax.random.uniform(
        kb, (n_outputs,), minval=-bound, maxval=bound, dtype=jnp.float32
    )

    y = linear_regression_forward(x, weight, bias)
    jax.block_until_ready(y)
    assert y.shape == (batch, n_outputs)
    assert jnp.allclose(y, x @ weight.T + bias, atol=1e-4, rtol=1e-4)

    # Exercise the row-tiled, ragged-last-block paths too (B clears the bytes gate):
    #   (a) O==1 lane-dense output + SMEM bias, 2 grid steps, second block ragged.
    kx2, kw2, kb2 = jax.random.split(jax.random.PRNGKey(1), 3)
    x2 = jax.random.normal(kx2, (4500, 32), dtype=jnp.float32)
    w2 = jax.random.uniform(kw2, (1, 32), minval=-0.2, maxval=0.2, dtype=jnp.float32)
    b2 = jax.random.uniform(kb2, (1,), minval=-0.2, maxval=0.2, dtype=jnp.float32)
    y2 = linear_regression_forward(x2, w2, b2)
    jax.block_until_ready(y2)
    assert y2.shape == (4500, 1)
    assert jnp.allclose(y2, x2 @ w2.T + b2, atol=1e-4, rtol=1e-4)

    #   (b) general-O MXU path, weight kept in (O, F) layout, ragged last block.
    kx3, kw3, kb3 = jax.random.split(jax.random.PRNGKey(2), 3)
    x3 = jax.random.normal(kx3, (4500, 32), dtype=jnp.float32)
    w3 = jax.random.uniform(kw3, (4, 32), minval=-0.2, maxval=0.2, dtype=jnp.float32)
    b3 = jax.random.uniform(kb3, (4,), minval=-0.2, maxval=0.2, dtype=jnp.float32)
    y3 = linear_regression_forward(x3, w3, b3)
    jax.block_until_ready(y3)
    assert y3.shape == (4500, 4)
    assert jnp.allclose(y3, x3 @ w3.T + b3, atol=1e-4, rtol=1e-4)

    print("KERNEL_OK")
</pallas_src>

<mosaic_0001>
module attributes {stable_mosaic.version = 11 : i64} {
  func.func @_linear_o1_kernel(%arg0: memref<8x32xf32, #tpu.memory_space<vmem>>, %arg1: memref<1x32xf32, #tpu.memory_space<vmem>>, %arg2: memref<1xf32, #tpu.memory_space<smem>>, %arg3: memref<1x8xf32, #tpu.memory_space<vmem>>) attributes {dimension_semantics = [], scalar_prefetch = 0 : i64, scratch_operands = 0 : i64, tpu.core_type = #tpu.core_type<tc>} {
    %c0 = arith.constant 0 : index
    %c0_0 = arith.constant 0 : index
    %0 = vector.load %arg1[%c0, %c0_0] : memref<1x32xf32, #tpu.memory_space<vmem>>, vector<1x32xf32>
    %c0_1 = arith.constant 0 : index
    %c0_2 = arith.constant 0 : index
    %1 = vector.load %arg0[%c0_1, %c0_2] : memref<8x32xf32, #tpu.memory_space<vmem>>, vector<8x32xf32>
    %cst = arith.constant dense<0.000000e+00> : vector<1x8xf32>
    %2 = tpu.matmul %0, %1, %cst {dimension_numbers = #tpu.dot_dimension_numbers<[1], [1], [0], [0], [0, 0, 1, 0], [], []>} : vector<1x32xf32>, vector<8x32xf32>, vector<1x8xf32> -> vector<1x8xf32>
    %c0_3 = arith.constant 0 : index
    %3 = memref.load %arg2[%c0_3] : memref<1xf32, #tpu.memory_space<smem>>
    %4 = vector.broadcast %3 : f32 to vector<1x8xf32>
    %5 = arith.addf %2, %4 : vector<1x8xf32>
    %c0_4 = arith.constant 0 : index
    %c0_5 = arith.constant 0 : index
    %6 = vector.load %arg3[%c0_4, %c0_5] : memref<1x8xf32, #tpu.memory_space<vmem>>, vector<1x8xf32>
    tpu.vector_store %arg3[%c0_4, %c0_5], %5 {strides = array<i32>} : memref<1x8xf32, #tpu.memory_space<vmem>>, vector<1x8xf32>,
    return
  }
}

</mosaic_0001>

<bundles_post_ra>
// kernel: tpu_custom_call.1
= control target key start
LH: loop header
LB: loop body
LE: loop exit
PB: predicated region body
PF: predicated region fallthrough
CT: control target
= control target key end

     0   :  { %9 = vsyncpa [#allocation4], 0  ;;  %s241_s0 = inlined_call_operand.hbm [shape: f32[8,32], index: 0, kind: input, shape index: {}]   ;;  %s242_s1 = inlined_call_operand.vmem [shape: f32[1,32], index: 1, kind: input, shape index: {}]   ;;  %s243_s2 = inlined_call_operand.<no memory space> [shape: f32[1], index: 2, kind: input, shape index: {}]   ;;  %s244_s3 = inlined_call_operand.hbm [shape: f32[1,8], index: 3, kind: output, shape index: {}]  }
   0x1   :  { %10 = vsyncpa [#allocation5], 0  ;;  %s187_s12 = smov [#allocation3]   ;;  %s139_s16 = scalar_lea.hbm %s241_s0, 128 }
   0x2   :  { %s17_s13 = sshll.u32 %s187_s12, 4  ;;  %p140_p0 = scmp.ne.s32.totalorder %s241_s0, %s139_s16  ;;  %s18_s13 = int_to_ptr.vmem [resolvable:$true] %s17_s13 }
   0x3   :  { %p143_p1 = scmp.lt.u32.totalorder %s139_s16, %s241_s0 }
   0x5   :  { %p145_p2 = pnand %p143_p1, %p140_p0 }
   0x7   :  { %148 = shalt.err (!%p145_p2)
}
   0x8   :  { %s149_s21 = scalar_lea.vmem %s18_s13, 128  ;;  %p154_p4 = scmp.lt.s32.totalorder %s18_s13, %s18_s13 }
   0x9   :  { %p150_p3 = scmp.ne.s32.totalorder %s18_s13, %s149_s21  ;;  %p155_p5 = scmp.lt.s32.totalorder %s149_s21, %s149_s21 }
   0xb   :  { %p156_p6 = por %p155_p5, %p154_p4 }
   0xd   :  { %p157_p7 = pnand %p156_p6, %p150_p3 }
   0xf   :  { %160 = shalt.err (!%p157_p7)
}
  0x10   :  { %20 = dma.hbm_to_vmem [thread:$0]  %s241_s0, 128, %s18_s13, [#allocation4]  }
  0x11   :  { %183 = dma.done.wait [#allocation4], 128  }
  0x12   :  { %184 = vsyncadd [#allocation4], 4294967168  ;;  %v188_v0 = vmov 0.0   ;;  %vm189_vm0 = vmmov 0   ;;  %vm32_vm1 = vcmask 261120   ;;  %v29_v1 = vld [vmem:[#allocation3] sm:$0xff]  ;;  %v31_v3 = vstv %s243_s2 }
  0x13   :  { %130 = vmatprep.subr.mxu0 %v188_v0  ;;  %132 = vmatprep.mubr.msk.f32.mxu0 %vm189_vm0, %v188_v0  ;;  %v28_v2 = vld [vmem:[%s242_s1] sm:$0x1]  ;;  %s190_s28 = smov [#allocation6]   ;;  %vm109_vm2 = vcmask 57344  }
  0x14   :  { %131 = vmatpush3.xpose.msk.msra.mxu0 %vm32_vm1, %v29_v1  ;;  %s117_s0 = sshll.u32 %s190_s28, 4  ;;  %s118_s0 = int_to_ptr.vmem [resolvable:$true] %s117_s0 }
  0x15   :  { %s161_s29 = scalar_lea.vmem %s118_s0, 16  ;;  %s165_s30 = scalar_lea.vmem %s118_s0, 32 }
  0x16   :  { %p162_p8 = scmp.ne.s32.totalorder %s118_s0, %s161_s29  ;;  %p166_p9 = scmp.lt.s32.totalorder %s118_s0, %s118_s0 }
  0x17   :  { %133 = vmatmul.mubr.msk.f32.vlgmr.msra.gmra.mrb[0].mxu0 %vm32_vm1, %v28_v2  ;;  %p167_p10 = scmp.lt.s32.totalorder %s165_s30, %s161_s29 }
  0x19   :  { %p168_p11 = por %p167_p10, %p166_p9 }
  0x1b   :  { %p169_p12 = pnand %p168_p11, %p162_p8 }
  0xea   :  { %v105_v4 = vpop.f32.mrb[0].mxu0 }
  0xeb   :  { %v106_v5 = vadd.f32 %v105_v4, %v31_v3  ;;  %v134_v6 = vpop.f32.mrb[1].mxu0 }
  0xed   :  { %110 = vst.msk [vmem:[#allocation6] sm:$0x1] %vm109_vm2, %v106_v5 }
  0xee   :  { %172 = shalt.err (!%p169_p12)
}
  0xef   :  { %s173_s2 = scalar_lea.hbm %s244_s3, 16 }
  0xf0   :  { %p174_p13 = scmp.ne.s32.totalorder %s244_s3, %s173_s2  ;;  %p177_p0 = scmp.lt.u32.totalorder %s173_s2, %s244_s3 }
  0xf2   :  { %p179_p1 = pnand %p177_p0, %p174_p13 }
  0xf4   :  { %182 = shalt.err (!%p179_p1)
}
  0xf5   :  { %120 = dma.vmem_to_hbm [thread:$0]  %s118_s0, 16, %s244_s3, [#allocation5]  }
  0xf6   :  { %185 = dma.done.wait [#allocation5], 16  }
  0xf7   :  { %186 = vsyncadd [#allocation5], 4294967280 }
  0xf8   :  { %124 = vsyncpa [#allocation4], 1 }
  0xf9   :  { %125 = vsyncpa [#allocation5], 1 }

</bundles_post_ra>
